<compile_context>
chip_gen: v6e
topology: v6e:2x2x1
jax: 0.10.0
libtpu: 0.0.40
codegen_flags: <defaults>
</compile_context>

<pallas_src>
import functools

import jax
import jax.numpy as jnp
from jax.experimental import pallas as pl
from jax.experimental.pallas import tpu as pltpu


def _round_up(x, m):
    return (x + m - 1) // m * m


def _default_min_grid_steps():
    """>= 2 grid steps on v7x (2 TensorCores/chip) so 'parallel' sharding helps."""
    try:
        kind = jax.devices()[0].device_kind.lower()
        if "v7" in kind:
            return 2
    except Exception:
        pass
    return 1


# --------------------------------------------------------------------------- #
# Kernel
# --------------------------------------------------------------------------- #
def _mlp_disc_kernel(*refs, n_hidden: int, alpha: float):
    # refs = (x_ref, w0, b0, w1, b1, ..., w_L, b_L, out_ref)
    x_ref = refs[0]
    out_ref = refs[-1]
    param_refs = refs[1:-1]
    n_layers = n_hidden + 1  # hidden layers + final projection

    h = x_ref[...]  # bf16 activations feed the MXU
    for li in range(n_layers):
        w_ref = param_refs[2 * li]
        b_ref = param_refs[2 * li + 1]
        # bf16 x bf16 -> f32 accumulate on the MXU.
        acc = jnp.dot(h, w_ref[...], preferred_element_type=jnp.float32)
        acc = acc + b_ref[...]  # bias kept in f32
        if li < n_hidden:
            # ELU(alpha) in f32. exp(x)-1 instead of expm1: abs error near 0 is
            # ~1 ulp of 1.0 in f32 (negligible vs bf16 matmul error) and exp is
            # a guaranteed Mosaic lowering.
            acc = jnp.where(acc > 0, acc, alpha * (jnp.exp(acc) - 1.0))
            h = acc.astype(jnp.bfloat16)  # re-narrow only the next dot's input
        else:
            # sigmoid: exp and approx-reciprocal both land on the EUP slot.
            # TODO(synk): use approx=False / jax.nn.sigmoid if downstream loss
            # math needs a tighter sigmoid near saturation.
            out_ref[...] = pl.reciprocal(
                1.0 + jnp.exp(-acc), approx=True
            ).astype(out_ref.dtype)


# --------------------------------------------------------------------------- #
# Parameter preparation (ONE-TIME, out of the hot path)
# --------------------------------------------------------------------------- #
def spectral_normalize(w):
    """W / sigma_max(W) — what SpectralNorm applies at forward time.

    Done ONCE at parameter setup (plain JAX), never per forward step.
    (PyTorch uses one-step power iteration that lags the exact sigma; we use the
    exact value since this is deterministic init, not a checkpoint replay.)
    """
    sigma = jnp.linalg.svd(w, compute_uv=False)[0]
    return w / sigma


def prepare_params(weights, biases):
    """Pad feature dims to multiples of 128 and cast weights to bf16 — once.

    weights[i]: [in_i, out_i] (pre-transposed for h @ W), biases[i]: [1, out_i].
    Returns (w_pad tuple [bf16], b_pad tuple [f32], out_dim).
    """
    in_dim = weights[0].shape[0]
    out_dim = weights[-1].shape[1]
    w_pad, b_pad = [], []
    cur_in_pad = _round_up(in_dim, 128)
    for w, b in zip(weights, biases):
        wi, wo = w.shape
        op = _round_up(wo, 128)
        wp = jnp.zeros((cur_in_pad, op), jnp.float32).at[:wi, :wo].set(w)
        bp = jnp.zeros((1, op), jnp.float32).at[:, :wo].set(b)
        w_pad.append(wp.astype(jnp.bfloat16))  # MXU operand
        b_pad.append(bp)                       # bias stays f32
        cur_in_pad = op
    return tuple(w_pad), tuple(b_pad), out_dim


def init_params(key, latent_dim, n_hidden, hidden_size, data_dim):
    """Deterministic Linear-style init; weights returned as [in, out], f32."""
    dims = [latent_dim] + [hidden_size] * n_hidden + [data_dim]
    weights, biases = [], []
    for i in range(len(dims) - 1):
        fan_in, fan_out = dims[i], dims[i + 1]
        key, kw, kb = jax.random.split(key, 3)
        bound = 1.0 / jnp.sqrt(fan_in)
        w = jax.random.uniform(kw, (fan_in, fan_out), jnp.float32, -bound, bound)
        b = jax.random.uniform(kb, (1, fan_out), jnp.float32, -bound, bound)
        # SpectralNorm wraps every Linear in MLP_d (including the last one).
        w = spectral_normalize(w)
        weights.append(w)
        biases.append(b)
    return weights, biases


# --------------------------------------------------------------------------- #
# Jitted forward (hot path)
# --------------------------------------------------------------------------- #
@functools.partial(
    jax.jit, static_argnames=("out_dim", "alpha", "max_tile_b", "min_grid_steps")
)
def _forward(z, w_pad, b_pad, *, out_dim, alpha, max_tile_b, min_grid_steps):
    n_layers = len(w_pad)
    n_hidden = n_layers - 1
    B, in_dim = z.shape
    in_pad = w_pad[0].shape[0]
    out_pad = w_pad[-1].shape[1]
    assert in_dim <= in_pad

    # ---- batch tiling: choose tile_b to divide padded batch with minimal waste,
    #      at least `min_grid_steps` tiles (megacore on v7x), multiple of 8 ----
    n_tiles = max(pl.cdiv(B, max_tile_b), min_grid_steps)
    tile_b = _round_up(pl.cdiv(B, n_tiles), 8)
    padded_b = n_tiles * tile_b

    # ---- pad z directly in bf16 (fused under jit; no f32 temp) ----
    z_pad = jnp.pad(
        z.astype(jnp.bfloat16), ((0, padded_b - B), (0, in_pad - in_dim))
    )

    # ---- specs: tiled activations, resident params (constant index_maps) ----
    params, in_specs = [], [pl.BlockSpec((tile_b, in_pad), lambda i: (i, 0))]
    for wp, bp in zip(w_pad, b_pad):
        params.append(wp)
        params.append(bp)
        in_specs.append(pl.BlockSpec(wp.shape, lambda i: (0, 0)))
        in_specs.append(pl.BlockSpec(bp.shape, lambda i: (0, 0)))
    out_specs = pl.BlockSpec((tile_b, out_pad), lambda i: (i, 0))

    # ---- honest VMEM budget: resident params + double-buffered bf16 tiles
    #      + live f32 intermediates, with ~2x slack (no 32/64 MiB floor/cap) ----
    param_bytes = sum(int(w.size) * 2 for w in w_pad) + sum(int(b.size) * 4 for b in b_pad)
    io_tile_bytes = 2 * tile_b * in_pad * 2 + 2 * tile_b * out_pad * 2  # dbl-buffered bf16
    max_pad = max(w.shape[1] for w in w_pad)
    interm_bytes = 4 * tile_b * max_pad * 4  # f32 intermediates / spill slack
    vmem_limit = int(max(2 * (param_bytes + io_tile_bytes + interm_bytes), 4 << 20))

    kernel = functools.partial(_mlp_disc_kernel, n_hidden=n_hidden, alpha=alpha)

    out = pl.pallas_call(
        kernel,
        out_shape=jax.ShapeDtypeStruct((padded_b, out_pad), jnp.bfloat16),
        grid=(n_tiles,),
        in_specs=in_specs,
        out_specs=out_specs,
        compiler_params=pltpu.CompilerParams(
            dimension_semantics=("parallel",),
            vmem_limit_bytes=vmem_limit,
        ),
    )(z_pad, *params)

    # Slice back the valid rows/cols and return f32 (tiny; fused under jit).
    return out[:B, :out_dim].astype(jnp.float32)


def discriminator_forward(z, w_pad, b_pad, out_dim, *, alpha=0.2,
                          max_tile_b=1024, min_grid_steps=None):
    """z: [B, latent_dim] f32; (w_pad, b_pad, out_dim) from prepare_params()."""
    if min_grid_steps is None:
        min_grid_steps = _default_min_grid_steps()
    return _forward(
        z, tuple(w_pad), tuple(b_pad),
        out_dim=int(out_dim), alpha=float(alpha),
        max_tile_b=int(max_tile_b), min_grid_steps=int(min_grid_steps),
    )


# --------------------------------------------------------------------------- #
# References
# --------------------------------------------------------------------------- #
def reference_forward(z, weights, biases, alpha=0.2):
    """Pure-f32 reference."""
    h = z
    n_hidden = len(weights) - 1
    for i, (w, b) in enumerate(zip(weights, biases)):
        h = h @ w + b
        if i < n_hidden:
            h = jnp.where(h > 0, h, alpha * (jnp.exp(h) - 1.0))
    return jax.nn.sigmoid(h)


def reference_forward_bf16(z, weights, biases, alpha=0.2):
    """Reference emulating the kernel's bf16-operand / f32-accumulate dots."""
    h = z.astype(jnp.bfloat16)
    n_hidden = len(weights) - 1
    for i, (w, b) in enumerate(zip(weights, biases)):
        acc = jnp.dot(h, w.astype(jnp.bfloat16), preferred_element_type=jnp.float32) + b
        if i < n_hidden:
            acc = jnp.where(acc > 0, acc, alpha * (jnp.exp(acc) - 1.0))
            h = acc.astype(jnp.bfloat16)
        else:
            h = acc
    return jax.nn.sigmoid(h)


if __name__ == "__main__":
    latent_dim, n_hidden, hidden_size, data_dim = 16, 2, 32, 8
    batch = 8

    key = jax.random.PRNGKey(0)
    key, kz = jax.random.split(key)
    z = jax.random.normal(kz, (batch, latent_dim), jnp.float32)

    weights, biases = init_params(key, latent_dim, n_hidden, hidden_size, data_dim)
    # One-time parameter transform (padding + bf16 cast), out of the hot path.
    w_pad, b_pad, out_dim = prepare_params(weights, biases)

    out = jax.block_until_ready(
        discriminator_forward(z, w_pad, b_pad, out_dim, alpha=0.2)
    )
    assert out.shape == (batch, data_dim)

    ref_bf16 = reference_forward_bf16(z, weights, biases, alpha=0.2)
    ref_f32 = reference_forward(z, weights, biases, alpha=0.2)
    # Tolerances account for the bf16 output writeback + approx reciprocal.
    assert jnp.allclose(out, ref_bf16, atol=1e-2, rtol=1e-2), "mismatch vs bf16 reference"
    assert jnp.allclose(out, ref_f32, atol=3e-2, rtol=3e-2), "mismatch vs f32 reference"

    # Second run exercising the multi-step batch grid with an exact-divide tile
    # (B=600, max_tile_b=256 -> tile_b=200, zero batch padding) and slice-back.
    key, kz2 = jax.random.split(key)
    z_big = jax.random.normal(kz2, (600, latent_dim), jnp.float32)
    out_big = jax.block_until_ready(
        discriminator_forward(z_big, w_pad, b_pad, out_dim, alpha=0.2, max_tile_b=256)
    )
    ref_big = reference_forward_bf16(z_big, weights, biases, alpha=0.2)
    assert out_big.shape == (600, data_dim)
    assert jnp.allclose(out_big, ref_big, atol=1e-2, rtol=1e-2), "mismatch (tiled batch)"

    # Third run: batch not a multiple of 8 exercises the row-padding path.
    key, kz3 = jax.random.split(key)
    z_odd = jax.random.normal(kz3, (7, latent_dim), jnp.float32)
    out_odd = jax.block_until_ready(
        discriminator_forward(z_odd, w_pad, b_pad, out_dim, alpha=0.2)
    )
    ref_odd = reference_forward_bf16(z_odd, weights, biases, alpha=0.2)
    assert out_odd.shape == (7, data_dim)
    assert jnp.allclose(out_odd, ref_odd, atol=1e-2, rtol=1e-2), "mismatch (padded batch)"

    print("KERNEL_OK")
</pallas_src>

<mosaic_0001>
module attributes {stable_mosaic.version = 11 : i64} {
  func.func @_mlp_disc_kernel(%arg0: i32, %arg1: memref<8x128xbf16, #tpu.memory_space<vmem>>, %arg2: memref<128x128xbf16, #tpu.memory_space<vmem>>, %arg3: memref<1x128xf32, #tpu.memory_space<vmem>>, %arg4: memref<128x128xbf16, #tpu.memory_space<vmem>>, %arg5: memref<1x128xf32, #tpu.memory_space<vmem>>, %arg6: memref<128x128xbf16, #tpu.memory_space<vmem>>, %arg7: memref<1x128xf32, #tpu.memory_space<vmem>>, %arg8: memref<8x128xbf16, #tpu.memory_space<vmem>>) attributes {dimension_semantics = [#tpu.dimension_semantics<parallel>], iteration_bounds = array<i64: 1>, scalar_prefetch = 0 : i64, scratch_operands = 0 : i64, tpu.core_type = #tpu.core_type<tc>, window_params = [{transform_indices = @transform_0, window_bounds = array<i64: 8, 128>}, {pipeline_mode = #tpu.pipeline_mode<synchronous>, transform_indices = @transform_1, window_bounds = array<i64: 128, 128>}, {pipeline_mode = #tpu.pipeline_mode<synchronous>, transform_indices = @transform_2, window_bounds = array<i64: 1, 128>}, {pipeline_mode = #tpu.pipeline_mode<synchronous>, transform_indices = @transform_3, window_bounds = array<i64: 128, 128>}, {pipeline_mode = #tpu.pipeline_mode<synchronous>, transform_indices = @transform_4, window_bounds = array<i64: 1, 128>}, {pipeline_mode = #tpu.pipeline_mode<synchronous>, transform_indices = @transform_5, window_bounds = array<i64: 128, 128>}, {pipeline_mode = #tpu.pipeline_mode<synchronous>, transform_indices = @transform_6, window_bounds = array<i64: 1, 128>}, {transform_indices = @transform_7, window_bounds = array<i64: 8, 128>}]} {
    %c0 = arith.constant 0 : index
    %c0_0 = arith.constant 0 : index
    %0 = vector.load %arg1[%c0, %c0_0] : memref<8x128xbf16, #tpu.memory_space<vmem>>, vector<8x128xbf16>
    %c0_1 = arith.constant 0 : index
    %c0_2 = arith.constant 0 : index
    %1 = vector.load %arg2[%c0_1, %c0_2] : memref<128x128xbf16, #tpu.memory_space<vmem>>, vector<128x128xbf16>
    %cst = arith.constant dense<0.000000e+00> : vector<8x128xf32>
    %2 = tpu.matmul %0, %1, %cst {dimension_numbers = #tpu.dot_dimension_numbers<[1], [0], [0], [1], [0, 0, 1, 1], [], []>} : vector<8x128xbf16>, vector<128x128xbf16>, vector<8x128xf32> -> vector<8x128xf32>
    %c0_3 = arith.constant 0 : index
    %c0_4 = arith.constant 0 : index
    %3 = vector.load %arg3[%c0_3, %c0_4] : memref<1x128xf32, #tpu.memory_space<vmem>>, vector<1x128xf32>
    %4 = vector.broadcast %3 : vector<1x128xf32> to vector<8x128xf32>
    %5 = arith.addf %2, %4 : vector<8x128xf32>
    %cst_5 = arith.constant 0.000000e+00 : f32
    %6 = vector.broadcast %cst_5 : f32 to vector<8x128xf32>
    %7 = arith.cmpf ogt, %5, %6 : vector<8x128xf32>
    %8 = math.exp %5 : vector<8x128xf32>
    %cst_6 = arith.constant 1.000000e+00 : f32
    %9 = vector.broadcast %cst_6 : f32 to vector<8x128xf32>
    %10 = arith.subf %8, %9 : vector<8x128xf32>
    %cst_7 = arith.constant 2.000000e-01 : f32
    %11 = vector.broadcast %cst_7 : f32 to vector<8x128xf32>
    %12 = arith.mulf %11, %10 : vector<8x128xf32>
    %13 = arith.select %7, %5, %12 : vector<8x128xi1>, vector<8x128xf32>
    %14 = arith.truncf %13 : vector<8x128xf32> to vector<8x128xbf16>
    %c0_8 = arith.constant 0 : index
    %c0_9 = arith.constant 0 : index
    %15 = vector.load %arg4[%c0_8, %c0_9] : memref<128x128xbf16, #tpu.memory_space<vmem>>, vector<128x128xbf16>
    %cst_10 = arith.constant dense<0.000000e+00> : vector<8x128xf32>
    %16 = tpu.matmul %14, %15, %cst_10 {dimension_numbers = #tpu.dot_dimension_numbers<[1], [0], [0], [1], [0, 0, 1, 1], [], []>} : vector<8x128xbf16>, vector<128x128xbf16>, vector<8x128xf32> -> vector<8x128xf32>
    %c0_11 = arith.constant 0 : index
    %c0_12 = arith.constant 0 : index
    %17 = vector.load %arg5[%c0_11, %c0_12] : memref<1x128xf32, #tpu.memory_space<vmem>>, vector<1x128xf32>
    %18 = vector.broadcast %17 : vector<1x128xf32> to vector<8x128xf32>
    %19 = arith.addf %16, %18 : vector<8x128xf32>
    %cst_13 = arith.constant 0.000000e+00 : f32
    %20 = vector.broadcast %cst_13 : f32 to vector<8x128xf32>
    %21 = arith.cmpf ogt, %19, %20 : vector<8x128xf32>
    %22 = math.exp %19 : vector<8x128xf32>
    %cst_14 = arith.constant 1.000000e+00 : f32
    %23 = vector.broadcast %cst_14 : f32 to vector<8x128xf32>
    %24 = arith.subf %22, %23 : vector<8x128xf32>
    %cst_15 = arith.constant 2.000000e-01 : f32
    %25 = vector.broadcast %cst_15 : f32 to vector<8x128xf32>
    %26 = arith.mulf %25, %24 : vector<8x128xf32>
    %27 = arith.select %21, %19, %26 : vector<8x128xi1>, vector<8x128xf32>
    %28 = arith.truncf %27 : vector<8x128xf32> to vector<8x128xbf16>
    %c0_16 = arith.constant 0 : index
    %c0_17 = arith.constant 0 : index
    %29 = vector.load %arg6[%c0_16, %c0_17] : memref<128x128xbf16, #tpu.memory_space<vmem>>, vector<128x128xbf16>
    %cst_18 = arith.constant dense<0.000000e+00> : vector<8x128xf32>
    %30 = tpu.matmul %28, %29, %cst_18 {dimension_numbers = #tpu.dot_dimension_numbers<[1], [0], [0], [1], [0, 0, 1, 1], [], []>} : vector<8x128xbf16>, vector<128x128xbf16>, vector<8x128xf32> -> vector<8x128xf32>
    %c0_19 = arith.constant 0 : index
    %c0_20 = arith.constant 0 : index
    %31 = vector.load %arg7[%c0_19, %c0_20] : memref<1x128xf32, #tpu.memory_space<vmem>>, vector<1x128xf32>
    %32 = vector.broadcast %31 : vector<1x128xf32> to vector<8x128xf32>
    %33 = arith.addf %30, %32 : vector<8x128xf32>
    %cst_21 = arith.constant 0.000000e+00 : f32
    %34 = vector.broadcast %cst_21 : f32 to vector<8x128xf32>
    %35 = arith.subf %34, %33 : vector<8x128xf32>
    %36 = math.exp %35 : vector<8x128xf32>
    %cst_22 = arith.constant 1.000000e+00 : f32
    %37 = vector.broadcast %cst_22 : f32 to vector<8x128xf32>
    %38 = arith.addf %37, %36 : vector<8x128xf32>
    %39 = tpu.reciprocal %38 {approx = true} : vector<8x128xf32> -> vector<8x128xf32>
    %40 = arith.truncf %39 : vector<8x128xf32> to vector<8x128xbf16>
    %c0_23 = arith.constant 0 : index
    %c0_24 = arith.constant 0 : index
    %41 = vector.load %arg8[%c0_23, %c0_24] : memref<8x128xbf16, #tpu.memory_space<vmem>>, vector<8x128xbf16>
    tpu.vector_store %arg8[%c0_23, %c0_24], %40 {strides = array<i32>} : memref<8x128xbf16, #tpu.memory_space<vmem>>, vector<8x128xbf16>,
    return
  }
  func.func @transform_0(%arg0: i32) -> (i32, i32) {
    %c0_i32 = arith.constant 0 : i32
    %c0_i32_0 = arith.constant 0 : i32
    return %arg0, %c0_i32 : i32, i32
  }
  func.func @transform_1(%arg0: i32) -> (i32, i32) {
    %c0_i32 = arith.constant 0 : i32
    %c0_i32_0 = arith.constant 0 : i32
    %c0_i32_1 = arith.constant 0 : i32
    return %c0_i32, %c0_i32_0 : i32, i32
  }
  func.func @transform_2(%arg0: i32) -> (i32, i32) {
    %c0_i32 = arith.constant 0 : i32
    %c0_i32_0 = arith.constant 0 : i32
    %c0_i32_1 = arith.constant 0 : i32
    return %c0_i32, %c0_i32_0 : i32, i32
  }
  func.func @transform_3(%arg0: i32) -> (i32, i32) {
    %c0_i32 = arith.constant 0 : i32
    %c0_i32_0 = arith.constant 0 : i32
    %c0_i32_1 = arith.constant 0 : i32
    return %c0_i32, %c0_i32_0 : i32, i32
  }
  func.func @transform_4(%arg0: i32) -> (i32, i32) {
    %c0_i32 = arith.constant 0 : i32
    %c0_i32_0 = arith.constant 0 : i32
    %c0_i32_1 = arith.constant 0 : i32
    return %c0_i32, %c0_i32_0 : i32, i32
  }
  func.func @transform_5(%arg0: i32) -> (i32, i32) {
    %c0_i32 = arith.constant 0 : i32
    %c0_i32_0 = arith.constant 0 : i32
    %c0_i32_1 = arith.constant 0 : i32
    return %c0_i32, %c0_i32_0 : i32, i32
  }
  func.func @transform_6(%arg0: i32) -> (i32, i32) {
    %c0_i32 = arith.constant 0 : i32
    %c0_i32_0 = arith.constant 0 : i32
    %c0_i32_1 = arith.constant 0 : i32
    return %c0_i32, %c0_i32_0 : i32, i32
  }
  func.func @transform_7(%arg0: i32) -> (i32, i32) {
    %c0_i32 = arith.constant 0 : i32
    %c0_i32_0 = arith.constant 0 : i32
    return %arg0, %c0_i32 : i32, i32
  }
}

</mosaic_0001>

<bundles_post_ra>
// kernel: _forward.1
= control target key start
LH: loop header
LB: loop body
LE: loop exit
PB: predicated region body
PF: predicated region fallthrough
CT: control target
= control target key end

     0   :  { %12 = vsyncpa [#allocation3], 0  ;;  %s749_s0 = inlined_call_operand.vmem [shape: bf16[8,128], index: 0, kind: input, shape index: {}]   ;;  %s750_s1 = inlined_call_operand.hbm [shape: bf16[128,128], index: 1, kind: input, shape index: {}]   ;;  %s751_s2 = inlined_call_operand.vmem [shape: f32[1,128], index: 2, kind: input, shape index: {}]   ;;  %s752_s3 = inlined_call_operand.hbm [shape: bf16[128,128], index: 3, kind: input, shape index: {}]   ;;  %s753_s4 = inlined_call_operand.vmem [shape: f32[1,128], index: 4, kind: input, shape index: {}]   ;;  %s754_s5 = inlined_call_operand.hbm [shape: bf16[128,128], index: 5, kind: input, shape index: {}]   ;;  %s755_s6 = inlined_call_operand.vmem [shape: f32[1,128], index: 6, kind: input, shape index: {}]   ;;  %s756_s7 = inlined_call_operand.vmem [shape: bf16[8,128], index: 7, kind: output, shape index: {}]  }
   0x1   :  { %13 = vsyncpa [#allocation5], 0  ;;  %s648_s24 = smov [#allocation4]   ;;  %s649_s26 = smov [#allocation2]  }
   0x2   :  { %s35_s25 = sshll.u32 %s648_s24, 4  ;;  %s21_s27 = sshll.u32 %s649_s26, 4  ;;  %s36_s25 = int_to_ptr.vmem [resolvable:$true] %s35_s25  ;;  %s22_s27 = int_to_ptr.vmem [resolvable:$true] %s21_s27 }
   0x3   :  { %s592_s28 = scalar_lea.vmem %s36_s25, 1024  ;;  %p597_p1 = scmp.lt.s32.totalorder %s36_s25, %s36_s25 }
   0x4   :  { %p593_p0 = scmp.ne.s32.totalorder %s36_s25, %s592_s28  ;;  %p598_p2 = scmp.lt.s32.totalorder %s592_s28, %s592_s28 }
   0x6   :  { %p599_p3 = por %p598_p2, %p597_p1 }
   0x8   :  { %p600_p4 = pnand %p599_p3, %p593_p0 }
   0xa   :  { %603 = shalt.err (!%p600_p4)
}
   0xb   :  { %s650_s29 = smov 64   ;;  %s651_s30 = smov 4  }
   0xc   :  { %41 = dma.hbm_to_vmem [thread:$0]  %s752_s3, 1024, %s36_s25, [#allocation5], %s650_s29, %s650_s29, %s651_s30  }
   0xd   :  { %s612_s10 = scalar_lea.vmem %s22_s27, 1024  ;;  %p617_p6 = scmp.lt.s32.totalorder %s22_s27, %s22_s27 }
   0xe   :  { %p613_p5 = scmp.ne.s32.totalorder %s22_s27, %s612_s10  ;;  %p618_p7 = scmp.lt.s32.totalorder %s612_s10, %s612_s10 }
  0x10   :  { %p619_p8 = por %p618_p7, %p617_p6 }
  0x12   :  { %p620_p9 = pnand %p619_p8, %p613_p5 }
  0x14   :  { %623 = shalt.err (!%p620_p9)
}
  0x15   :  { %27 = dma.hbm_to_vmem [thread:$0]  %s750_s1, 1024, %s22_s27, [#allocation3], %s650_s29, %s650_s29, %s651_s30  }
  0x16   :  { %s652_s13 = smov [#allocation6]  }
  0x17   :  { %s49_s14 = sshll.u32 %s652_s13, 4  ;;  %s50_s14 = int_to_ptr.vmem [resolvable:$true] %s49_s14 }
  0x18   :  { %s632_s15 = scalar_lea.vmem %s50_s14, 1024  ;;  %p637_p11 = scmp.lt.s32.totalorder %s50_s14, %s50_s14 }
  0x19   :  { %p633_p10 = scmp.ne.s32.totalorder %s50_s14, %s632_s15  ;;  %p638_p12 = scmp.lt.s32.totalorder %s632_s15, %s632_s15 }
  0x1b   :  { %p639_p13 = por %p638_p12, %p637_p11 }
  0x1d   :  { %p640_p0 = pnand %p639_p13, %p633_p10 }
  0x1f   :  { %643 = shalt.err (!%p640_p0)
}
  0x20   :  { %55 = dma.hbm_to_vmem [thread:$0]  %s754_s5, 1024, %s50_s14, [#allocation5], %s650_s29, %s650_s29, %s651_s30  }
  0x21   :  { %644 = dma.done.wait [#allocation3], 1024  }
  0x22   :  { %645 = vsyncadd [#allocation3], 4294966272 }
  0x23   :  { %646 = dma.done.wait [#allocation5], 2048  }
  0x24   :  { %647 = vsyncadd [#allocation5], 4294965248  ;;  %v653_v0 = vmov 0.0   ;;  %vm654_vm0 = vmmov 0   ;;  %v552_v1 = vld [vmem:[#allocation2 + $0x38] sm:$0xff]   ;;  %v553_v2 = vld [vmem:[#allocation2 + $0x30] sm:$0xff]  }
  0x25   :  { %485 = vmatprep.subr.bf16.mxu0 %v653_v0  ;;  %501 = vmatprep.mubr.msk.bf16.mxu0 %vm654_vm0, %v653_v0  ;;  %v554_v3 = vld [vmem:[#allocation2 + $0x28] sm:$0xff]   ;;  %v560_v4 = vld [vmem:[#allocation4 + $0x38] sm:$0xff]   ;;  %v555_v5 = vld [vmem:[#allocation2 + $0x20] sm:$0xff]  }
  0x26   :  { %505 = vmatprep.subr.bf16.mxu1 %v653_v0  ;;  %521 = vmatprep.mubr.msk.bf16.mxu1 %vm654_vm0, %v653_v0  ;;  %v561_v6 = vld [vmem:[#allocation4 + $0x30] sm:$0xff]   ;;  %v556_v7 = vld [vmem:[#allocation2 + $0x18] sm:$0xff]   ;;  %v558_v9 = vld [vmem:[#allocation2 + $0x8] sm:$0xff]  }
  0x27   :  { %486 = vmatpush3.bf16.msra.mxu0 %v552_v1  ;;  %506 = vmatpush3.bf16.msra.mxu1 %v560_v4  ;;  %v557_v8 = vld [vmem:[#allocation2 + $0x10] sm:$0xff]   ;;  %v559_v10 = vld [vmem:[#allocation2] sm:$0xff]   ;;  %v562_v12 = vld [vmem:[#allocation4 + $0x28] sm:$0xff]  }
  0x28   :  { %487 = vmatprep.subr.bf16.mxu0 %v653_v0  ;;  %507 = vmatprep.subr.bf16.mxu1 %v653_v0  ;;  %v68_v11 = vld [vmem:[%s749_s0] sm:$0xf]  ;;  %v564_v14 = vld [vmem:[#allocation4 + $0x18] sm:$0xff]   ;;  %v565_v15 = vld [vmem:[#allocation4 + $0x10] sm:$0xff]  }
  0x29   :  { %v563_v13 = vld [vmem:[#allocation4 + $0x20] sm:$0xff]   ;;  %v566_v16 = vld [vmem:[#allocation4 + $0x8] sm:$0xff]   ;;  %v568_v18 = vld [vmem:[#allocation6 + $0x38] sm:$0xff]  }
  0x2a   :  { %v567_v17 = vld [vmem:[#allocation4] sm:$0xff]   ;;  %v569_v19 = vld [vmem:[#allocation6 + $0x30] sm:$0xff]   ;;  %v570_v32 = vld [vmem:[#allocation6 + $0x28] sm:$0xff]  }
  0x2b   :  { %488 = vmatpush3.bf16.msra.mxu0 %v553_v2  ;;  %508 = vmatpush3.bf16.msra.mxu1 %v561_v6  ;;  %v429_v20 = vld [vmem:[%s751_s2] ss:$0 sm:$0xff]  ;;  %v572_v34 = vld [vmem:[#allocation6 + $0x18] sm:$0xff]   ;;  %v573_v35 = vld [vmem:[#allocation6 + $0x10] sm:$0xff]  }
  0x2c   :  { %489 = vmatprep.subr.bf16.mxu0 %v653_v0  ;;  %509 = vmatprep.subr.bf16.mxu1 %v653_v0  ;;  %v571_v33 = vld [vmem:[#allocation6 + $0x20] sm:$0xff]   ;;  %v574_v36 = vld [vmem:[#allocation6 + $0x8] sm:$0xff]  }
  0x2d   :  { %v575_v37 = vld [vmem:[#allocation6] sm:$0xff]  }
  0x2e   :  { %v439_v38 = vld [vmem:[%s753_s4] ss:$0 sm:$0xff] }
  0x2f   :  { %490 = vmatpush3.bf16.msra.mxu0 %v554_v3  ;;  %510 = vmatpush3.bf16.msra.mxu1 %v562_v12  ;;  %v449_v50 = vld [vmem:[%s755_s6] ss:$0 sm:$0xff] }
  0x30   :  { %491 = vmatprep.subr.bf16.mxu0 %v653_v0  ;;  %511 = vmatprep.subr.bf16.mxu1 %v653_v0 }
  0x33   :  { %492 = vmatpush3.bf16.msra.mxu0 %v555_v5  ;;  %512 = vmatpush3.bf16.msra.mxu1 %v563_v13 }
  0x34   :  { %493 = vmatprep.subr.bf16.mxu0 %v653_v0  ;;  %513 = vmatprep.subr.bf16.mxu1 %v653_v0 }
  0x37   :  { %494 = vmatpush3.bf16.msra.mxu0 %v556_v7  ;;  %514 = vmatpush3.bf16.msra.mxu1 %v564_v14 }
  0x38   :  { %495 = vmatprep.subr.bf16.mxu0 %v653_v0  ;;  %515 = vmatprep.subr.bf16.mxu1 %v653_v0 }
  0x3b   :  { %496 = vmatpush3.bf16.msra.mxu0 %v557_v8  ;;  %516 = vmatpush3.bf16.msra.mxu1 %v565_v15 }
  0x3c   :  { %497 = vmatprep.subr.bf16.mxu0 %v653_v0  ;;  %517 = vmatprep.subr.bf16.mxu1 %v653_v0 }
  0x3f   :  { %498 = vmatpush3.bf16.msra.mxu0 %v558_v9  ;;  %518 = vmatpush3.bf16.msra.mxu1 %v566_v16 }
  0x40   :  { %499 = vmatprep.subr.bf16.mxu0 %v653_v0  ;;  %519 = vmatprep.subr.bf16.mxu1 %v653_v0 }
  0x43   :  { %500 = vmatpush3.bf16.msra.mxu0 %v559_v10  ;;  %520 = vmatpush3.bf16.msra.mxu1 %v567_v17 }
  0x44   :  { %525 = vmatprep.subr.bf16.mxu0 %v653_v0 }
  0x46   :  { %502 = vmatmul.mubr.bf16.vlgmr.msra.gmra.mxu0 %v68_v11 }
  0x47   :  { %541 = vmatprep.mubr.msk.bf16.mxu0 %vm654_vm0, %v653_v0  ;;  %526 = vmatpush3.bf16.msra.mxu0 %v568_v18 }
  0x48   :  { %527 = vmatprep.subr.bf16.mxu0 %v653_v0 }
  0x4b   :  { %528 = vmatpush3.bf16.msra.mxu0 %v569_v19 }
  0x4c   :  { %529 = vmatprep.subr.bf16.mxu0 %v653_v0 }
  0x4f   :  { %530 = vmatpush3.bf16.msra.mxu0 %v570_v32 }
  0x50   :  { %531 = vmatprep.subr.bf16.mxu0 %v653_v0 }
  0x53   :  { %532 = vmatpush3.bf16.msra.mxu0 %v571_v33 }
  0x54   :  { %533 = vmatprep.subr.bf16.mxu0 %v653_v0 }
  0x57   :  { %534 = vmatpush3.bf16.msra.mxu0 %v572_v34 }
  0x58   :  { %535 = vmatprep.subr.bf16.mxu0 %v653_v0 }
  0x5b   :  { %536 = vmatpush3.bf16.msra.mxu0 %v573_v35 }
  0x5c   :  { %537 = vmatprep.subr.bf16.mxu0 %v653_v0 }
  0x5f   :  { %538 = vmatpush3.bf16.msra.mxu0 %v574_v36 }
  0x60   :  { %539 = vmatprep.subr.bf16.mxu0 %v653_v0 }
  0x63   :  { %540 = vmatpush3.bf16.msra.mxu0 %v575_v37 }
 0x106   :  { %v174_v21 = vpop.f32.mrf.mxu0 }
 0x107   :  { %v175_v22 = vadd.f32 %v429_v20, %v174_v21 }
 0x108   :  { %v503_v23 = vpop.f32.mrf.mxu0 }
 0x109   :  { %v181_v24 = vmul.f32 1.442695, %v175_v22  ;;  %vm180_vm1 = vcmp.gt.f32.partialorder %v175_v22, 0.0 }
 0x10a   :  { %v177_v25 = vpop.f32.mrf.mxu0 }
 0x10b   :  { %576 = vpow2.f32 %v181_v24 }
 0x10c   :  { %v504_v26 = vpop.f32.mrf.mxu0 }
 0x118   :  { %v577_v27 = vpop.eup %576 }
 0x119   :  { %v438_v28 = vadd.f32 -1.0, %v577_v27 }
 0x11b   :  { %v184_v29 = vmul.f32 0.2, %v438_v28 }
 0x11d   :  { %v185_v30 = vsel %vm180_vm1, %v175_v22, %v184_v29 }
 0x11e   :  { %v186_v31 = vpack.c.bf16 %v185_v30, %v185_v30 }
 0x120   :  { %522 = vmatmul.mubr.bf16.vlgmr.msra.gmra.mxu1 %v186_v31 }
 0x1e0   :  { %v292_v39 = vpop.f32.mrf.mxu1 }
 0x1e1   :  { %v293_v40 = vadd.f32 %v439_v38, %v292_v39 }
 0x1e2   :  { %v523_v41 = vpop.f32.mrf.mxu1 }
 0x1e3   :  { %v299_v42 = vmul.f32 1.442695, %v293_v40  ;;  %vm298_vm2 = vcmp.gt.f32.partialorder %v293_v40, 0.0 }
 0x1e4   :  { %v295_v43 = vpop.f32.mrf.mxu1 }
 0x1e5   :  { %578 = vpow2.f32 %v299_v42 }
 0x1e6   :  { %v524_v44 = vpop.f32.mrf.mxu1 }
 0x1f2   :  { %v579_v45 = vpop.eup %578 }
 0x1f3   :  { %v448_v46 = vadd.f32 -1.0, %v579_v45 }
 0x1f5   :  { %v302_v47 = vmul.f32 0.2, %v448_v46 }
 0x1f7   :  { %v303_v48 = vsel %vm298_vm2, %v293_v40, %v302_v47 }
 0x1f8   :  { %v304_v49 = vpack.c.bf16 %v303_v48, %v303_v48 }
 0x1fa   :  { %542 = vmatmul.mubr.bf16.vlgmr.msra.gmra.mxu0 %v304_v49 }
 0x2ba   :  { %v410_v51 = vpop.f32.mrf.mxu0 }
 0x2bb   :  { %v411_v52 = vadd.f32 %v449_v50, %v410_v51 }
 0x2bc   :  { %v543_v53 = vpop.f32.mrf.mxu0 }
 0x2bd   :  { %v416_v54 = vsub.f32 0.0, %v411_v52 }
 0x2be   :  { %v413_v55 = vpop.f32.mrf.mxu0 }
 0x2bf   :  { %v417_v56 = vmul.f32 1.442695, %v416_v54 }
 0x2c0   :  { %v544_v57 = vpop.f32.mrf.mxu0 }
 0x2c1   :  { %580 = vpow2.f32 %v417_v56 }
 0x2ce   :  { %v581_v58 = vpop.eup %580 }
 0x2cf   :  { %v419_v59 = vadd.f32 1.0, %v581_v58 }
 0x2d1   :  { %582 = vrcp.f32 %v419_v59 }
 0x2de   :  { %v583_v60 = vpop.eup %582 }
 0x2df   :  { %v421_v61 = vpack.c.bf16 %v583_v60, %v583_v60 }
 0x2e1   :  { %422 = vst [vmem:[%s756_s7] sm:$0xf] %v421_v61 }
 0x2e2   :  { %427 = vsyncpa [#allocation3], 1 }
 0x2e3   :  { %428 = vsyncpa [#allocation5], 1 }

</bundles_post_ra>
